<compile_context>
chip_gen: v5e
topology: v5e:2x2
jax: 0.10.0
libtpu: 0.0.40
codegen_flags: <defaults>
</compile_context>

<pallas_src>
import math

import jax
import jax.numpy as jnp
from jax import lax
from jax.experimental import pallas as pl
from jax.experimental.pallas import tpu as pltpu


def _transition_kernel(x_ref, w1_ref, b1_ref, w2_ref, b2_ref, o_ref, acc_ref):
    # grid = (m_tiles, h_tiles); axis 1 is the hidden (reduction for linear2)
    # axis. Output block index is constant across axis 1 -> resident acc.
    j = pl.program_id(1)

    @pl.when(j == 0)
    def _():
        acc_ref[...] = jnp.zeros_like(acc_ref)

    # linear1 slice: (tm, D) @ (D, th) -> f32 (tm, th). Operands in bf16
    # (or whatever compute dtype the weights were stored as).
    x = x_ref[...].astype(w1_ref.dtype)
    h = jnp.dot(x, w1_ref[...], preferred_element_type=jnp.float32)
    h = h + b1_ref[...]

    # Exact erf GELU (matches nn.GELU() default), computed in f32 on the VPU.
    h = 0.5 * h * (1.0 + lax.erf(h * (1.0 / math.sqrt(2.0))))

    # linear2 partial sum: (tm, th) @ (th, D) accumulated in f32.
    acc_ref[...] += jnp.dot(h.astype(w2_ref.dtype), w2_ref[...],
                            preferred_element_type=jnp.float32)

    @pl.when(j == pl.num_programs(1) - 1)
    def _():
        o_ref[...] = (acc_ref[...] + b2_ref[...]).astype(o_ref.dtype)


def _round_up(x, n):
    return ((x + n - 1) // n) * n


def _pick_tile_h(hidden, dim, weight_itemsize, tile_h=None,
                 weight_budget_bytes=8 << 20):
    """Largest hidden tile that (a) divides hidden, (b) is a multiple of 128,
    (c) keeps the double-buffered W1+W2 tiles within weight_budget_bytes."""
    if tile_h is None:
        # 2 weights x 2 buffers x dim x th x itemsize <= budget
        tile_h = max(128, weight_budget_bytes // (4 * dim * weight_itemsize))
    if hidden <= tile_h or hidden % 128 != 0:
        return hidden  # fully resident (or odd size -> keep whole, it's small)
    best = 128
    t = 256
    while t <= tile_h:
        if hidden % t == 0:
            best = t
        t += 128
    return best


def transition_forward(x, w1, b1, w2, b2, *, tile_m=256, tile_h=None,
                       compute_dtype=jnp.bfloat16):
    """x: (..., dim). w1: (dim, 4*dim), b1: (4*dim,), w2: (4*dim, dim),
    b2: (dim,). Returns same shape/dtype as x. Matmuls run in `compute_dtype`
    with f32 accumulation."""
    orig_shape = x.shape
    dim = orig_shape[-1]
    hidden = w1.shape[1]
    x2d = x.reshape(-1, dim)
    m = x2d.shape[0]

    # bf16 operands for the MXU; biases stay f32 (added to the f32 accumulator).
    w1c = w1.astype(compute_dtype)
    w2c = w2.astype(compute_dtype)
    b1_2d = b1.reshape(1, hidden).astype(jnp.float32)
    b2_2d = b2.reshape(1, dim).astype(jnp.float32)

    # M tile: sublane-aligned; ragged last block handled by Pallas (rows are
    # independent, OOB stores are masked) -> no host-side pad/slice copies.
    tm = min(tile_m, _round_up(m, 8))
    c_itemsize = jnp.dtype(compute_dtype).itemsize
    th = _pick_tile_h(hidden, dim, c_itemsize, tile_h)

    grid = (pl.cdiv(m, tm), hidden // th)

    # Explicit scoped-VMEM limit: double-buffered x/out/W tiles + biases +
    # accumulator + f32 intermediate, with headroom.
    x_itemsize = jnp.dtype(x.dtype).itemsize
    est = (2 * tm * dim * x_itemsize          # x tiles (double-buffered)
           + 2 * tm * dim * x_itemsize        # out tiles
           + 4 * dim * th * c_itemsize        # W1 + W2 tiles (double-buffered)
           + 2 * (th + dim) * 4               # biases
           + tm * dim * 4                     # f32 accumulator scratch
           + 2 * tm * th * 4)                 # f32 intermediate h (+ bf16 copy)
    vmem_limit = int(min(max(2 * est, 32 << 20), 112 << 20))

    out = pl.pallas_call(
        _transition_kernel,
        out_shape=jax.ShapeDtypeStruct((m, dim), x.dtype),
        grid_spec=pltpu.PrefetchScalarGridSpec(
            num_scalar_prefetch=0,
            grid=grid,
            in_specs=[
                pl.BlockSpec((tm, dim), lambda i, j: (i, 0)),   # x tile
                pl.BlockSpec((dim, th), lambda i, j: (0, j)),   # W1 column-block
                pl.BlockSpec((1, th), lambda i, j: (0, j)),     # b1 slice
                pl.BlockSpec((th, dim), lambda i, j: (j, 0)),   # W2 row-block
                pl.BlockSpec((1, dim), lambda i, j: (0, 0)),    # b2
            ],
            out_specs=pl.BlockSpec((tm, dim), lambda i, j: (i, 0)),
            scratch_shapes=[pltpu.VMEM((tm, dim), jnp.float32)],
        ),
        compiler_params=pltpu.CompilerParams(
            dimension_semantics=("parallel", "arbitrary"),
            vmem_limit_bytes=vmem_limit),
    )(x2d, w1c, b1_2d, w2c, b2_2d)

    return out.reshape(orig_shape)


def init_transition_params(key, dim, dtype=jnp.float32):
    """Deterministic init matching nn.Linear shapes (weights stored as (in, out))."""
    k1, k2, k3, k4 = jax.random.split(key, 4)
    hidden = dim * 4
    # PyTorch nn.Linear default init: U(-1/sqrt(fan_in), 1/sqrt(fan_in))
    lim1 = 1.0 / math.sqrt(dim)
    lim2 = 1.0 / math.sqrt(hidden)
    w1 = jax.random.uniform(k1, (dim, hidden), dtype, -lim1, lim1)
    b1 = jax.random.uniform(k2, (hidden,), dtype, -lim1, lim1)
    w2 = jax.random.uniform(k3, (hidden, dim), dtype, -lim2, lim2)
    b2 = jax.random.uniform(k4, (dim,), dtype, -lim2, lim2)
    return w1, b1, w2, b2


def _reference(x, w1, b1, w2, b2):
    h = x @ w1 + b1
    h = 0.5 * h * (1.0 + lax.erf(h / jnp.sqrt(2.0).astype(h.dtype)))
    return h @ w2 + b2


if __name__ == "__main__":
    key = jax.random.PRNGKey(0)
    kx, kp = jax.random.split(key)

    # dim=128 -> hidden=512: small but lane-dense (128-multiple) feature dims.
    batch, seq, dim = 2, 8, 128
    x = jax.random.normal(kx, (batch, seq, dim), jnp.float32)
    w1, b1, w2, b2 = init_transition_params(kp, dim)

    y = transition_forward(x, w1, b1, w2, b2)
    y = jax.block_until_ready(y)

    y_ref = _reference(x, w1, b1, w2, b2)
    assert y.shape == x.shape and y.dtype == x.dtype
    # bf16 matmul operands with f32 accumulation -> small drift vs f32 reference.
    assert jnp.allclose(y, y_ref, atol=5e-2, rtol=5e-2), (
        "mismatch vs reference: max abs diff "
        f"{float(jnp.max(jnp.abs(y - y_ref)))}")

    print("KERNEL_OK")
</pallas_src>

<mosaic_0001>
module attributes {stable_mosaic.version = 11 : i64} {
  func.func @_transition_kernel(%arg0: i32, %arg1: i32, %arg2: memref<16x128xf32, #tpu.memory_space<vmem>>, %arg3: memref<128x512xbf16, #tpu.memory_space<vmem>>, %arg4: memref<1x512xf32, #tpu.memory_space<vmem>>, %arg5: memref<512x128xbf16, #tpu.memory_space<vmem>>, %arg6: memref<1x128xf32, #tpu.memory_space<vmem>>, %arg7: memref<16x128xf32, #tpu.memory_space<vmem>>, %arg8: memref<16x128xf32, #tpu.memory_space<vmem>>) attributes {dimension_semantics = [#tpu.dimension_semantics<parallel>, #tpu.dimension_semantics<arbitrary>], iteration_bounds = array<i64: 1, 1>, scalar_prefetch = 0 : i64, scratch_operands = 1 : i64, tpu.core_type = #tpu.core_type<tc>, window_params = [{transform_indices = @transform_0, window_bounds = array<i64: 16, 128>}, {transform_indices = @transform_1, window_bounds = array<i64: 128, 512>}, {transform_indices = @transform_2, window_bounds = array<i64: 1, 512>}, {transform_indices = @transform_3, window_bounds = array<i64: 512, 128>}, {pipeline_mode = #tpu.pipeline_mode<synchronous>, transform_indices = @transform_4, window_bounds = array<i64: 1, 128>}, {transform_indices = @transform_5, window_bounds = array<i64: 16, 128>}]} {
    %c0_i32 = arith.constant 0 : i32
    %0 = arith.cmpi eq, %arg1, %c0_i32 : i32
    %1 = arith.extui %0 : i1 to i32
    %c0_i32_0 = arith.constant 0 : i32
    %2 = arith.cmpi ne, %1, %c0_i32_0 : i32
    scf.if %2 {
      %cst_18 = arith.constant 0.000000e+00 : f32
      %27 = vector.broadcast %cst_18 : f32 to vector<16x128xf32>
      %c0_19 = arith.constant 0 : index
      %c0_20 = arith.constant 0 : index
      %28 = vector.load %arg8[%c0_19, %c0_20] : memref<16x128xf32, #tpu.memory_space<vmem>>, vector<16x128xf32>
      tpu.vector_store %arg8[%c0_19, %c0_20], %27 {strides = array<i32>} : memref<16x128xf32, #tpu.memory_space<vmem>>, vector<16x128xf32>,
    } else {
    }
    %c0 = arith.constant 0 : index
    %c0_1 = arith.constant 0 : index
    %3 = vector.load %arg2[%c0, %c0_1] : memref<16x128xf32, #tpu.memory_space<vmem>>, vector<16x128xf32>
    %4 = arith.truncf %3 : vector<16x128xf32> to vector<16x128xbf16>
    %c0_2 = arith.constant 0 : index
    %c0_3 = arith.constant 0 : index
    %5 = vector.load %arg3[%c0_2, %c0_3] : memref<128x512xbf16, #tpu.memory_space<vmem>>, vector<128x512xbf16>
    %cst = arith.constant dense<0.000000e+00> : vector<16x512xf32>
    %6 = tpu.matmul %4, %5, %cst {dimension_numbers = #tpu.dot_dimension_numbers<[1], [0], [0], [1], [0, 0, 1, 1], [], []>} : vector<16x128xbf16>, vector<128x512xbf16>, vector<16x512xf32> -> vector<16x512xf32>
    %c0_4 = arith.constant 0 : index
    %c0_5 = arith.constant 0 : index
    %7 = vector.load %arg4[%c0_4, %c0_5] : memref<1x512xf32, #tpu.memory_space<vmem>>, vector<1x512xf32>
    %8 = vector.broadcast %7 : vector<1x512xf32> to vector<16x512xf32>
    %9 = arith.addf %6, %8 : vector<16x512xf32>
    %cst_6 = arith.constant 5.000000e-01 : f32
    %10 = vector.broadcast %cst_6 : f32 to vector<16x512xf32>
    %11 = arith.mulf %10, %9 : vector<16x512xf32>
    %cst_7 = arith.constant 0.707106769 : f32
    %12 = vector.broadcast %cst_7 : f32 to vector<16x512xf32>
    %13 = arith.mulf %9, %12 : vector<16x512xf32>
    %14 = math.erf %13 : vector<16x512xf32>
    %cst_8 = arith.constant 1.000000e+00 : f32
    %15 = vector.broadcast %cst_8 : f32 to vector<16x512xf32>
    %16 = arith.addf %15, %14 : vector<16x512xf32>
    %17 = arith.mulf %11, %16 : vector<16x512xf32>
    %c0_9 = arith.constant 0 : index
    %c0_10 = arith.constant 0 : index
    %18 = vector.load %arg8[%c0_9, %c0_10] : memref<16x128xf32, #tpu.memory_space<vmem>>, vector<16x128xf32>
    %19 = arith.truncf %17 : vector<16x512xf32> to vector<16x512xbf16>
    %c0_11 = arith.constant 0 : index
    %c0_12 = arith.constant 0 : index
    %20 = vector.load %arg5[%c0_11, %c0_12] : memref<512x128xbf16, #tpu.memory_space<vmem>>, vector<512x128xbf16>
    %cst_13 = arith.constant dense<0.000000e+00> : vector<16x128xf32>
    %21 = tpu.matmul %19, %20, %cst_13 {dimension_numbers = #tpu.dot_dimension_numbers<[1], [0], [0], [1], [0, 0, 1, 1], [], []>} : vector<16x512xbf16>, vector<512x128xbf16>, vector<16x128xf32> -> vector<16x128xf32>
    %22 = arith.addf %18, %21 : vector<16x128xf32>
    %c0_14 = arith.constant 0 : index
    %c0_15 = arith.constant 0 : index
    %23 = vector.load %arg8[%c0_14, %c0_15] : memref<16x128xf32, #tpu.memory_space<vmem>>, vector<16x128xf32>
    tpu.vector_store %arg8[%c0_14, %c0_15], %22 {strides = array<i32>} : memref<16x128xf32, #tpu.memory_space<vmem>>, vector<16x128xf32>,
    %c0_i32_16 = arith.constant 0 : i32
    %24 = arith.cmpi eq, %arg1, %c0_i32_16 : i32
    %25 = arith.extui %24 : i1 to i32
    %c0_i32_17 = arith.constant 0 : i32
    %26 = arith.cmpi ne, %25, %c0_i32_17 : i32
    scf.if %26 {
      %c0_18 = arith.constant 0 : index
      %c0_19 = arith.constant 0 : index
      %27 = vector.load %arg8[%c0_18, %c0_19] : memref<16x128xf32, #tpu.memory_space<vmem>>, vector<16x128xf32>
      %c0_20 = arith.constant 0 : index
      %c0_21 = arith.constant 0 : index
      %28 = vector.load %arg6[%c0_20, %c0_21] : memref<1x128xf32, #tpu.memory_space<vmem>>, vector<1x128xf32>
      %29 = vector.broadcast %28 : vector<1x128xf32> to vector<16x128xf32>
      %30 = arith.addf %27, %29 : vector<16x128xf32>
      %c0_22 = arith.constant 0 : index
      %c0_23 = arith.constant 0 : index
      %31 = vector.load %arg7[%c0_22, %c0_23] : memref<16x128xf32, #tpu.memory_space<vmem>>, vector<16x128xf32>
      tpu.vector_store %arg7[%c0_22, %c0_23], %30 {strides = array<i32>} : memref<16x128xf32, #tpu.memory_space<vmem>>, vector<16x128xf32>,
    } else {
    }
    return
  }
  func.func @transform_0(%arg0: i32, %arg1: i32) -> (i32, i32) {
    %c0_i32 = arith.constant 0 : i32
    %c0_i32_0 = arith.constant 0 : i32
    return %arg0, %c0_i32 : i32, i32
  }
  func.func @transform_1(%arg0: i32, %arg1: i32) -> (i32, i32) {
    %c0_i32 = arith.constant 0 : i32
    %c0_i32_0 = arith.constant 0 : i32
    return %c0_i32, %arg1 : i32, i32
  }
  func.func @transform_2(%arg0: i32, %arg1: i32) -> (i32, i32) {
    %c0_i32 = arith.constant 0 : i32
    %c0_i32_0 = arith.constant 0 : i32
    return %c0_i32, %arg1 : i32, i32
  }
  func.func @transform_3(%arg0: i32, %arg1: i32) -> (i32, i32) {
    %c0_i32 = arith.constant 0 : i32
    %c0_i32_0 = arith.constant 0 : i32
    return %arg1, %c0_i32 : i32, i32
  }
  func.func @transform_4(%arg0: i32, %arg1: i32) -> (i32, i32) {
    %c0_i32 = arith.constant 0 : i32
    %c0_i32_0 = arith.constant 0 : i32
    %c0_i32_1 = arith.constant 0 : i32
    return %c0_i32, %c0_i32_0 : i32, i32
  }
  func.func @transform_5(%arg0: i32, %arg1: i32) -> (i32, i32) {
    %c0_i32 = arith.constant 0 : i32
    %c0_i32_0 = arith.constant 0 : i32
    return %arg0, %c0_i32 : i32, i32
  }
}

</mosaic_0001>

<bundles_post_ra>
// kernel: tpu_custom_call.1
= control target key start
LH: loop header
LB: loop body
LE: loop exit
PB: predicated region body
PF: predicated region fallthrough
CT: control target
= control target key end

     0   :  { %10 = vsyncpa [#allocation4], 0  ;;  %s1963_s0 = inlined_call_operand.hbm [shape: f32[16,128], index: 0, kind: input, shape index: {}]   ;;  %s1964_s1 = inlined_call_operand.hbm [shape: bf16[128,512], index: 1, kind: input, shape index: {}]   ;;  %s1965_s2 = inlined_call_operand.hbm [shape: f32[1,512], index: 2, kind: input, shape index: {}]   ;;  %s1966_s3 = inlined_call_operand.hbm [shape: bf16[512,128], index: 3, kind: input, shape index: {}]   ;;  %s1967_s4 = inlined_call_operand.vmem [shape: f32[1,128], index: 4, kind: input, shape index: {}]   ;;  %s1968_s5 = inlined_call_operand.hbm [shape: f32[16,128], index: 5, kind: output, shape index: {}]  }
   0x1   :  { %11 = vsyncpa [#allocation7], 0 }
   0x2   :  { %12 = vsyncpa [#allocation10], 0  ;;  %s31_s20 = sshll.u32 %s1964_s1, 4  ;;  %s32_s20 = int_to_ptr.hbm [resolvable:$true] %s31_s20 }
   0x3   :  { %13 = vsyncpa [#allocation5], 0  ;;  %s1541_s21 = smov [#allocation6]   ;;  %s18_s25 = sshll.u32 %s1963_s0, 4  ;;  %s19_s25 = int_to_ptr.hbm [resolvable:$true] %s18_s25 }
   0x4   :  { %s33_s22 = sshll.u32 %s1541_s21, 4  ;;  %s1542_s26 = smov 256   ;;  %s34_s22 = int_to_ptr.vmem [resolvable:$true] %s33_s22 }
   0x5   :  { %s1543_s27 = smov 16   ;;  %s1544_s28 = smov [#allocation3]  }
   0x6   :  { %39 = dma.hbm_to_vmem [thread:$0]  %s32_s20, 4096, %s34_s22, [#allocation7], %s1542_s26, %s1542_s26, %s1543_s27  }
   0x7   :  { %s20_s29 = sshll.u32 %s1544_s28, 4  ;;  %s1545_s30 = smov 128   ;;  %s21_s29 = int_to_ptr.vmem [resolvable:$true] %s20_s29 }
   0x8   :  { %s1546_s6 = smov 8   ;;  %s45_s8 = sshll.u32 %s1965_s2, 4  ;;  %s46_s8 = int_to_ptr.hbm [resolvable:$true] %s45_s8 }
   0x9   :  { %26 = dma.hbm_to_vmem [thread:$0]  %s19_s25, 256, %s21_s29, [#allocation4], %s1545_s30, %s1545_s30, %s1546_s6  }
   0xa   :  { %s1547_s9 = smov [#allocation8]   ;;  %s55_s12 = sshll.u32 %s1966_s3, 4  ;;  %s56_s12 = int_to_ptr.hbm [resolvable:$true] %s55_s12 }
   0xb   :  { %s47_s0 = sshll.u32 %s1547_s9, 4  ;;  %s1548_s13 = smov [#allocation9]   ;;  %s48_s0 = int_to_ptr.vmem [resolvable:$true] %s47_s0 }
   0xc   :  { %50 = dma.hbm_to_vmem [thread:$0]  %s46_s8, 64, %s48_s0, [#allocation7]  }
   0xd   :  { %s57_s14 = sshll.u32 %s1548_s13, 4  ;;  %s1549_s15 = smov 64   ;;  %s58_s14 = int_to_ptr.vmem [resolvable:$true] %s57_s14 }
   0xe   :  { %s1550_s16 = smov 4  }
   0xf   :  { %63 = dma.hbm_to_vmem [thread:$0]  %s56_s12, 4096, %s58_s14, [#allocation10], %s1549_s15, %s1549_s15, %s1550_s16  }
  0x10   :  { %1533 = dma.done.wait [#allocation4], 256  }
  0x11   :  { %1534 = vsyncadd [#allocation4], 4294967040 }
  0x12   :  { %1535 = dma.done.wait [#allocation7], 4160  }
  0x13   :  { %1536 = vsyncadd [#allocation7], 4294963136 }
  0x14   :  { %1537 = dma.done.wait [#allocation10], 4096  }
  0x15   :  { %1538 = vsyncadd [#allocation10], 4294963200  ;;  %v1171_v0 = vld [vmem:[#allocation6 + $0xe0] sm:$0xf]  ;;  %v1351_v1 = vld [vmem:[#allocation6 + $0xec] sm:$0xf0] }
  0x16   :  { %v1349_v2 = vld [vmem:[#allocation6 + $0xe4] sm:$0xf]  ;;  %v1172_v3 = vor.u32 %v1351_v1, %v1171_v0  ;;  %v1173_v4 = vld [vmem:[#allocation6 + $0xf0] sm:$0xf0]  ;;  %v1179_v5 = vld [vmem:[#allocation6 + $0xe8] sm:$0xf] }
  0x17   :  { %v1352_v6 = vld [vmem:[#allocation6 + $0xf4] sm:$0xf0]  ;;  %v1176_v7 = vor.u32 %v1349_v2, %v1173_v4  ;;  %v1350_v9 = vld [vmem:[#allocation6 + $0xec] sm:$0xf]  ;;  %v1181_v10 = vld [vmem:[#allocation6 + $0xf8] sm:$0xf0] }
  0x18   :  { %v1180_v8 = vor.u32 %v1352_v6, %v1179_v5  ;;  %v1155_v11 = vld [vmem:[#allocation6 + $0xc0] sm:$0xf]  ;;  %293 = vmatpush.bf16.msra.mxu0 %v1172_v3  ;;  %v1184_v12 = vor.u32 %v1350_v9, %v1181_v10  ;;  %v1347_v13 = vld [vmem:[#allocation6 + $0xcc] sm:$0xf0]  ;;  %v1345_v14 = vld [vmem:[#allocation6 + $0xc4] sm:$0xf] }
  0x19   :  { %v1157_v15 = vld [vmem:[#allocation6 + $0xd0] sm:$0xf0]  ;;  %307 = vmatpush.bf16.msra.mxu1 %v1176_v7  ;;  %v1156_v16 = vor.u32 %v1347_v13, %v1155_v11  ;;  %v1163_v18 = vld [vmem:[#allocation6 + $0xc8] sm:$0xf]  ;;  %v1348_v19 = vld [vmem:[#allocation6 + $0xd4] sm:$0xf0] }
  0x1a   :  { %321 = vmatpush.bf16.msra.mxu2 %v1180_v8  ;;  %v1160_v17 = vor.u32 %v1345_v14, %v1157_v15  ;;  %v1346_v20 = vld [vmem:[#allocation6 + $0xcc] sm:$0xf]  ;;  %335 = vmatpush.bf16.msra.mxu3 %v1184_v12  ;;  %v1164_v21 = vor.u32 %v1348_v19, %v1163_v18  ;;  %v1165_v22 = vld [vmem:[#allocation6 + $0xd8] sm:$0xf0]  ;;  %v1139_v23 = vld [vmem:[#allocation6 + $0xa0] sm:$0xf] }
  0x1b   :  { %v1343_v24 = vld [vmem:[#allocation6 + $0xac] sm:$0xf0]  ;;  %v1168_v25 = vor.u32 %v1346_v20, %v1165_v22  ;;  %v1341_v26 = vld [vmem:[#allocation6 + $0xa4] sm:$0xf]  ;;  %v1141_v27 = vld [vmem:[#allocation6 + $0xb0] sm:$0xf0] }
  0x1c   :  { %v1147_v28 = vld [vmem:[#allocation6 + $0xa8] sm:$0xf]  ;;  %294 = vmatpush.bf16.msra.mxu0 %v1156_v16  ;;  %v1140_v29 = vor.u32 %v1343_v24, %v1139_v23  ;;  %v1344_v30 = vld [vmem:[#allocation6 + $0xb4] sm:$0xf0]  ;;  %v1342_v31 = vld [vmem:[#allocation6 + $0xac] sm:$0xf]  ;;  %v1144_v33 = vor.u32 %v1341_v26, %v1141_v27 }
  0x1d   :  { %v1149_v32 = vld [vmem:[#allocation6 + $0xb8] sm:$0xf0]  ;;  %308 = vmatpush.bf16.msra.mxu1 %v1160_v17  ;;  %v1148_v34 = vor.u32 %v1344_v30, %v1147_v28  ;;  %v1123_v35 = vld [vmem:[#allocation6 + $0x80] sm:$0xf]  ;;  %v1339_v36 = vld [vmem:[#allocation6 + $0x8c] sm:$0xf0] }
  0x1e   :  { %322 = vmatpush.bf16.msra.mxu2 %v1164_v21  ;;  %v1337_v37 = vld [vmem:[#allocation6 + $0x84] sm:$0xf]  ;;  %336 = vmatpush.bf16.msra.mxu3 %v1168_v25  ;;  %v1152_v38 = vor.u32 %v1342_v31, %v1149_v32  ;;  %v1125_v39 = vld [vmem:[#allocation6 + $0x90] sm:$0xf0]  ;;  %v1131_v40 = vld [vmem:[#allocation6 + $0x88] sm:$0xf]  ;;  %v1124_v44 = vor.u32 %v1339_v36, %v1123_v35 }
  0x1f   :  { %v1340_v41 = vld [vmem:[#allocation6 + $0x94] sm:$0xf0]  ;;  %v1338_v42 = vld [vmem:[#allocation6 + $0x8c] sm:$0xf]  ;;  %v1133_v43 = vld [vmem:[#allocation6 + $0x98] sm:$0xf0]  ;;  %v1128_v45 = vor.u32 %v1337_v37, %v1125_v39 }
  0x20   :  { %295 = vmatpush.bf16.msra.mxu0 %v1140_v29  ;;  %v1132_v46 = vor.u32 %v1340_v41, %v1131_v40  ;;  %v1107_v47 = vld [vmem:[#allocation6 + $0x60] sm:$0xf]  ;;  %v1335_v48 = vld [vmem:[#allocation6 + $0x6c] sm:$0xf0]  ;;  %v1333_v49 = vld [vmem:[#allocation6 + $0x64] sm:$0xf]  ;;  %v1136_v50 = vor.u32 %v1338_v42, %v1133_v43 }
  0x21   :  { %309 = vmatpush.bf16.msra.mxu1 %v1144_v33  ;;  %v1109_v51 = vld [vmem:[#allocation6 + $0x70] sm:$0xf0]  ;;  %v1115_v52 = vld [vmem:[#allocation6 + $0x68] sm:$0xf]  ;;  %v1336_v53 = vld [vmem:[#allocation6 + $0x74] sm:$0xf0]  ;;  %v1108_v56 = vor.u32 %v1335_v48, %v1107_v47 }
  0x22   :  { %323 = vmatpush.bf16.msra.mxu2 %v1148_v34  ;;  %337 = vmatpush.bf16.msra.mxu3 %v1152_v38  ;;  %v1334_v54 = vld [vmem:[#allocation6 + $0x6c] sm:$0xf]  ;;  %v1117_v55 = vld [vmem:[#allocation6 + $0x78] sm:$0xf0]  ;;  %v1112_v57 = vor.u32 %v1333_v49, %v1109_v51  ;;  %v1116_v58 = vor.u32 %v1336_v53, %v1115_v52  ;;  %v1091_v59 = vld [vmem:[#allocation6 + $0x40] sm:$0xf] }
  0x23   :  { %v1331_v60 = vld [vmem:[#allocation6 + $0x4c] sm:$0xf0]  ;;  %v1329_v61 = vld [vmem:[#allocation6 + $0x44] sm:$0xf]  ;;  %v1120_v62 = vor.u32 %v1334_v54, %v1117_v55  ;;  %v1093_v63 = vld [vmem:[#allocation6 + $0x50] sm:$0xf0] }
  0x24   :  { %296 = vmatpush.bf16.msra.mxu0 %v1124_v44  ;;  %v1099_v0 = vld [vmem:[#allocation6 + $0x48] sm:$0xf]  ;;  %v1332_v1 = vld [vmem:[#allocation6 + $0x54] sm:$0xf0]  ;;  %v1330_v2 = vld [vmem:[#allocation6 + $0x4c] sm:$0xf]  ;;  %v1092_v4 = vor.u32 %v1331_v60, %v1091_v59  ;;  %v1096_v5 = vor.u32 %v1329_v61, %v1093_v63 }
  0x25   :  { %310 = vmatpush.bf16.msra.mxu1 %v1128_v45  ;;  %v1101_v3 = vld [vmem:[#allocation6 + $0x58] sm:$0xf0]  ;;  %v1100_v6 = vor.u32 %v1332_v1, %v1099_v0  ;;  %v1075_v7 = vld [vmem:[#allocation6 + $0x20] sm:$0xf]  ;;  %v1327_v8 = vld [vmem:[#allocation6 + $0x2c] sm:$0xf0] }
  0x26   :  { %324 = vmatpush.bf16.msra.mxu2 %v1132_v46  ;;  %338 = vmatpush.bf16.msra.mxu3 %v1136_v50  ;;  %v1325_v9 = vld [vmem:[#allocation6 + $0x24] sm:$0xf]  ;;  %v1104_v10 = vor.u32 %v1330_v2, %v1101_v3  ;;  %v1077_v11 = vld [vmem:[#allocation6 + $0x30] sm:$0xf0]  ;;  %v1083_v12 = vld [vmem:[#allocation6 + $0x28] sm:$0xf]  ;;  %v1076_v16 = vor.u32 %v1327_v8, %v1075_v7 }
  0x27   :  { %v1328_v13 = vld [vmem:[#allocation6 + $0x34] sm:$0xf0]  ;;  %v1326_v14 = vld [vmem:[#allocation6 + $0x2c] sm:$0xf]  ;;  %v1085_v15 = vld [vmem:[#allocation6 + $0x38] sm:$0xf0]  ;;  %v1080_v17 = vor.u32 %v1325_v9, %v1077_v11 }
  0x28   :  { %297 = vmatpush.bf16.msra.mxu0 %v1108_v56  ;;  %v1084_v18 = vor.u32 %v1328_v13, %v1083_v12  ;;  %v1059_v19 = vld [vmem:[#allocation6] sm:$0xf]  ;;  %v1323_v20 = vld [vmem:[#allocation6 + $0xc] sm:$0xf0]  ;;  %v1321_v21 = vld [vmem:[#allocation6 + $0x4] sm:$0xf]  ;;  %v1088_v22 = vor.u32 %v1326_v14, %v1085_v15 }
  0x29   :  { %311 = vmatpush.bf16.msra.mxu1 %v1112_v57  ;;  %v1061_v23 = vld [vmem:[#allocation6 + $0x10] sm:$0xf0]  ;;  %v1067_v24 = vld [vmem:[#allocation6 + $0x8] sm:$0xf]  ;;  %v1324_v25 = vld [vmem:[#allocation6 + $0x14] sm:$0xf0]  ;;  %v1060_v28 = vor.u32 %v1323_v20, %v1059_v19 }
  0x2a   :  { %325 = vmatpush.bf16.msra.mxu2 %v1116_v58  ;;  %339 = vmatpush.bf16.msra.mxu3 %v1120_v62  ;;  %v1322_v26 = vld [vmem:[#allocation6 + $0xc] sm:$0xf]  ;;  %v1069_v27 = vld [vmem:[#allocation6 + $0x18] sm:$0xf0]  ;;  %v88_v29 = vld [vmem:[#allocation3] sm:$0xff]  ;;  %v1064_v31 = vor.u32 %v1321_v21, %v1061_v23  ;;  %v1068_v32 = vor.u32 %v1324_v25, %v1067_v24  ;;  %s1551_s17 = smov [#allocation11]  }
  0x2b   :  { %v89_v30 = vld [vmem:[#allocation3 + $0x8] sm:$0xff]  ;;  %v1072_v33 = vor.u32 %v1322_v26, %v1069_v27  ;;  %v1597_v35 = vld [vmem:[#allocation8] sm:$0xf]  ;;  %s1040_s18 = sshll.u32 %s1551_s17, 4  ;;  %s1042_s21 = sshll.u32 %s1968_s5, 4  ;;  %s1041_s18 = int_to_ptr.vmem [resolvable:$true] %s1040_s18  ;;  %s1043_s21 = int_to_ptr.hbm [resolvable:$true] %s1042_s21 }
  0x2c   :  { %298 = vmatpush.bf16.msra.mxu0 %v1092_v4  ;;  %v90_v34 = vpack.c.bf16 %v89_v30, %v88_v29  ;;  %v125_v36 = vperm.slane %v1597_v35, 0  ;;  %v126_v37 = vperm.slane %v1597_v35, 1  ;;  %v127_v44 = vperm.slane %v1597_v35, 2 }
  0x2d   :  { %312 = vmatpush.bf16.msra.mxu1 %v1096_v5  ;;  %v128_v54 = vperm.slane %v1597_v35, 3 }
  0x2e   :  { %326 = vmatpush.bf16.msra.mxu2 %v1100_v6  ;;  %340 = vmatpush.bf16.msra.mxu3 %v1104_v10 }
  0x30   :  { %299 = vmatpush.bf16.msra.mxu0 %v1076_v16 }
  0x31   :  { %313 = vmatpush.bf16.msra.mxu1 %v1080_v17 }
  0x32   :  { %327 = vmatpush.bf16.msra.mxu2 %v1084_v18  ;;  %341 = vmatpush.bf16.msra.mxu3 %v1088_v22 }
  0x34   :  { %300 = vmatpush.bf16.msra.mxu0 %v1060_v28 }
  0x35   :  { %314 = vmatpush.bf16.msra.mxu1 %v1064_v31 }
  0x36   :  { %328 = vmatpush.bf16.msra.mxu2 %v1068_v32  ;;  %342 = vmatpush.bf16.msra.mxu3 %v1072_v33 }
  0x37   :  { %301 = vmatmul.bf16.vlgmr.msra.gmra.mxu0 %v90_v34 }
  0x38   :  { %315 = vmatmul.bf16.vlgmr.msra.gmra.mxu1 %v90_v34 }
  0x39   :  { %329 = vmatmul.bf16.vlgmr.msra.gmra.mxu2 %v90_v34  ;;  %343 = vmatmul.bf16.vlgmr.msra.gmra.mxu3 %v90_v34 }
  0xb4   :  { %v302_v38 = vpop.f32.mrf.mxu0 }
  0xb5   :  { %v1601_v39 = vadd.f32 %v302_v38, %v125_v36  ;;  %v316_v40 = vpop.f32.mrf.mxu1 }
  0xb6   :  { %v1605_v41 = vadd.f32 %v316_v40, %v126_v37 }
  0xb7   :  { %v1608_v42 = vmul.f32 0.70710677, %v1601_v39 }
  0xb8   :  { %v1611_v43 = vmul.f32 0.70710677, %v1605_v41 }
  0xb9   :  { %v365_v45 = vmul.f32 %v1608_v42, %v1608_v42 }
  0xba   :  { %v405_v46 = vmul.f32 %v1611_v43, %v1611_v43 }
  0xbb   :  { %v1618_v47 = vmin.f32 %v365_v45, 16.0 }
  0xbc   :  { %v330_v48 = vpop.f32.mrf.mxu2  ;;  %v1620_v49 = vmin.f32 %v405_v46, 16.0  ;;  %v344_v57 = vpop.f32.mrf.mxu3 }
  0xbd   :  { %v1624_v50 = vadd.f32 %v330_v48, %v127_v44  ;;  %v378_v51 = vmul.f32 3.8918573e-05, %v1618_v47  ;;  %v367_v52 = vmul.f32 2.1237322e-06, %v1618_v47  ;;  %v1640_v0 = vadd.f32 %v344_v57, %v128_v54  ;;  %v304_v1 = vpop.f32.mrf.mxu0  ;;  %v318_v29 = vpop.f32.mrf.mxu1 }
  0xbe   :  { %v418_v53 = vmul.f32 3.8918573e-05, %v1620_v49  ;;  %v407_v60 = vmul.f32 2.1237322e-06, %v1620_v49  ;;  %v1645_v7 = vadd.f32 %v304_v1, %v125_v36  ;;  %v319_v40 = vadd.f32 %v318_v29, %v126_v37 }
  0xbf   :  { %v379_v55 = vadd.f32 0.001143296, %v378_v51  ;;  %v1631_v56 = vmul.f32 0.70710677, %v1624_v50  ;;  %v368_v62 = vadd.f32 0.00028619796, %v367_v52 }
  0xc0   :  { %v419_v58 = vadd.f32 0.001143296, %v418_v53  ;;  %v408_v6 = vadd.f32 0.00028619796, %v407_v60  ;;  %v1650_v10 = vmul.f32 0.70710677, %v1640_v0 }
  0xc1   :  { %v380_v59 = vmul.f32 %v379_v55, %v1618_v47  ;;  %v445_v61 = vmul.f32 %v1631_v56, %v1631_v56  ;;  %v369_v8 = vmul.f32 %v368_v62, %v1618_v47  ;;  %v1656_v16 = vmul.f32 0.70710677, %v1645_v7 }
  0xc2   :  { %v420_v63 = vmul.f32 %v419_v58, %v1620_v49  ;;  %v409_v14 = vmul.f32 %v408_v6, %v1620_v49  ;;  %v485_v18 = vmul.f32 %v1650_v10, %v1650_v10  ;;  %v1683_v58 = vmul.f32 0.70710677, %v319_v40 }
  0xc3   :  { %v381_v2 = vadd.f32 0.014752088, %v380_v59  ;;  %v1642_v3 = vmin.f32 %v445_v61, 16.0  ;;  %v370_v17 = vadd.f32 0.0036580483, %v369_v8  ;;  %v525_v24 = vmul.f32 %v1656_v16, %v1656_v16 }
  0xc4   :  { %v421_v4 = vadd.f32 0.014752088, %v420_v63  ;;  %v410_v22 = vadd.f32 0.0036580483, %v409_v14  ;;  %v1665_v26 = vmin.f32 %v485_v18, 16.0  ;;  %v1707_v29 = vmul.f32 0.5, %v1601_v39 }
  0xc5   :  { %v382_v5 = vmul.f32 %v381_v2, %v1618_v47  ;;  %v458_v12 = vmul.f32 3.8918573e-05, %v1642_v3  ;;  %v371_v25 = vmul.f32 %v370_v17, %v1618_v47  ;;  %v447_v32 = vmul.f32 2.1237322e-06, %v1642_v3 }
  0xc6   :  { %v422_v9 = vmul.f32 %v421_v4, %v1620_v49  ;;  %v411_v30 = vmul.f32 %v410_v22, %v1620_v49  ;;  %v1672_v33 = vmin.f32 %v525_v24, 16.0  ;;  %v498_v36 = vmul.f32 3.8918573e-05, %v1665_v26 }
  0xc7   :  { %v383_v11 = vadd.f32 0.112945676, %v382_v5  ;;  %v459_v20 = vadd.f32 0.001143296, %v458_v12  ;;  %v372_v34 = vadd.f32 0.05243302, %v371_v25  ;;  %v565_v5 = vmul.f32 %v1683_v58, %v1683_v58  ;;  %v332_v25 = vpop.f32.mrf.mxu2 }
  0xc8   :  { %v423_v15 = vadd.f32 0.112945676, %v422_v9  ;;  %v412_v45 = vadd.f32 0.05243302, %v411_v30  ;;  %v448_v48 = vadd.f32 0.00028619796, %v447_v32 }
  0xc9   :  { %v384_v13 = vmul.f32 %v383_v11, %v1618_v47  ;;  %v460_v27 = vmul.f32 %v459_v20, %v1642_v3  ;;  %v527_v51 = vmul.f32 2.1237322e-06, %v1672_v33  ;;  %v373_v52 = vmul.f32 %v372_v34, %v1618_v47 }
  0xca   :  { %v424_v23 = vmul.f32 %v423_v15, %v1620_v49  ;;  %v499_v53 = vadd.f32 0.001143296, %v498_v36  ;;  %v538_v57 = vmul.f32 3.8918573e-05, %v1672_v33  ;;  %v413_v37 = vmul.f32 %v412_v45, %v1620_v49 }
  0xcb   :  { %v385_v19 = vadd.f32 0.4994258, %v384_v13  ;;  %v461_v38 = vadd.f32 0.014752088, %v460_v27  ;;  %v528_v59 = vadd.f32 0.00028619796, %v527_v51  ;;  %v449_v61 = vmul.f32 %v448_v48, %v1642_v3  ;;  %v346_v27 = vpop.f32.mrf.mxu3 }
  0xcc   :  { %v425_v31 = vadd.f32 0.4994258, %v424_v23  ;;  %v374_v63 = vadd.f32 0.18741608, %v373_v52  ;;  %v500_v1 = vmul.f32 %v499_v53, %v1665_v26  ;;  %v539_v4 = vadd.f32 0.001143296, %v538_v57 }
  0xcd   :  { %v386_v21 = vmul.f32 %v385_v19, %v1618_v47  ;;  %v462_v55 = vmul.f32 %v461_v38, %v1642_v3  ;;  %v487_v6 = vmul.f32 2.1237322e-06, %v1665_v26  ;;  %v529_v8 = vmul.f32 %v528_v59, %v1672_v33  ;;  %v1360_v59 = vld [vmem:[#allocation9 + $0x38] sm:$0xff] }
  0xce   :  { %v426_v46 = vmul.f32 %v425_v31, %v1620_v49  ;;  %v414_v11 = vadd.f32 0.18741608, %v413_v37  ;;  %v450_v12 = vadd.f32 0.0036580483, %v449_v61  ;;  %v375_v13 = vmul.f32 %v374_v63, %v1618_v47  ;;  %v1368_v37 = vld [vmem:[#allocation9 + $0x78] sm:$0xff]  ;;  %963 = vmatpush.bf16.msrb.mxu0 %v1360_v59 }
  0xcf   :  { %v1668_v28 = vadd.f32 1.0, %v386_v21  ;;  %v463_v2 = vadd.f32 0.112945676, %v462_v55  ;;  %v501_v14 = vadd.f32 0.014752088, %v500_v1  ;;  %v540_v15 = vmul.f32 %v539_v4, %v1672_v33  ;;  %977 = vmatpush.bf16.msrb.mxu1 %v1368_v37 }
  0xd0   :  { %v1686_v60 = vadd.f32 1.0, %v426_v46  ;;  %v1702_v18 = vmin.f32 %v565_v5, 16.0  ;;  %v530_v19 = vadd.f32 0.0036580483, %v529_v8  ;;  %v415_v22 = vmul.f32 %v414_v11, %v1620_v49 }
  0xd1   :  { %1397 = vrcp.f32 %v1668_v28  ;;  %v464_v17 = vmul.f32 %v463_v2, %v1642_v3  ;;  %v541_v20 = vadd.f32 0.014752088, %v540_v15  ;;  %v451_v23 = vmul.f32 %v450_v12, %v1642_v3 }
  0xd2   :  { %1399 = vrcp.f32 %v1686_v60  ;;  %v488_v24 = vadd.f32 0.00028619796, %v487_v6  ;;  %v376_v47 = vadd.f32 1.1283791, %v375_v13  ;;  %v502_v30 = vmul.f32 %v501_v14, %v1665_v26 }
  0xd3   :  { %v542_v31 = vmul.f32 %v541_v20, %v1672_v33  ;;  %v1714_v34 = vmul.f32 0.5, %v1605_v41  ;;  %v465_v36 = vadd.f32 0.4994258, %v464_v17  ;;  %v1717_v49 = vmul.f32 0.5, %v1645_v7  ;;  %v1359_v17 = vld [vmem:[#allocation9 + $0x30] sm:$0xff]  ;;  %v1382_v20 = vld [vmem:[#allocation9 + $0xe8] sm:$0xff] }
  0xd4   :  { %v567_v38 = vmul.f32 2.1237322e-06, %v1702_v18  ;;  %v531_v45 = vmul.f32 %v530_v19, %v1672_v33  ;;  %v1721_v39 = vmul.f32 0.5, %v319_v40  ;;  %v1725_v46 = vadd.f32 %v332_v25, %v127_v44  ;;  %v1367_v19 = vld [vmem:[#allocation9 + $0x70] sm:$0xff]  ;;  %v1384_v25 = vld [vmem:[#allocation9 + $0xf8] sm:$0xff]  ;;  %964 = vmatpush.bf16.msrb.mxu0 %v1359_v17 }
  0xd5   :  { %v1729_v48 = vadd.f32 %v346_v27, %v128_v54  ;;  %v416_v51 = vadd.f32 1.1283791, %v415_v22  ;;  %v452_v52 = vadd.f32 0.05243302, %v451_v23  ;;  %v489_v7 = vmul.f32 %v488_v24, %v1665_v26  ;;  %v1376_v24 = vld [vmem:[#allocation9 + $0xb8] sm:$0xff]  ;;  %978 = vmatpush.bf16.msrb.mxu1 %v1367_v19  ;;  %1005 = vmatpush.bf16.msrb.mxu3 %v1384_v25  ;;  %v1374_v19 = vld [vmem:[#allocation9 + $0xa8] sm:$0xff] }
  0xd6   :  { %v1734_v53 = vmul.f32 %v376_v47, %v1608_v42  ;;  %v503_v55 = vadd.f32 0.112945676, %v502_v30  ;;  %v543_v57 = vadd.f32 0.112945676, %v542_v31  ;;  %vm393_vm0 = vweird.f32 %v1668_v28  ;;  %991 = vmatpush.bf16.msrb.mxu2 %v1376_v24 }
  0xd7   :  { %v1689_v62 = vpop.eup %1397  ;;  %v397_v35 = vand.u32 2147483647, %v1668_v28  ;;  %v466_v44 = vmul.f32 %v465_v36, %v1642_v3  ;;  %v568_v54 = vadd.f32 0.00028619796, %v567_v38  ;;  %v399_v61 = vand.u32 2147483648, %v1668_v28 }
  0xd8   :  { %v389_v9 = vmul.f32 %v1689_v62, %v1668_v28  ;;  %v1711_v32 = vpop.eup %1399  ;;  %v532_v63 = vadd.f32 0.05243302, %v531_v45  ;;  %v544_v42 = vmul.f32 %v543_v57, %v1672_v33  ;;  %v578_v1 = vmul.f32 3.8918573e-05, %v1702_v18  ;;  %v1375_v57 = vld [vmem:[#allocation9 + $0xb0] sm:$0xff] }
  0xd9   :  { %v429_v40 = vmul.f32 %v1711_v32, %v1686_v60  ;;  %vm394_vm1 = vweird.f32 %v1689_v62  ;;  %v453_v4 = vmul.f32 %v452_v52, %v1642_v3  ;;  %v1748_v5 = vmul.f32 0.70710677, %v1725_v46  ;;  %v1366_v52 = vld [vmem:[#allocation9 + $0x68] sm:$0xff] }
  0xda   :  { %v390_v21 = vsub.f32 1.0, %v389_v9  ;;  %v504_v8 = vmul.f32 %v503_v55, %v1665_v26  ;;  %v545_v9 = vadd.f32 0.4994258, %v544_v42  ;;  %v579_v11 = vadd.f32 0.001143296, %v578_v1  ;;  %vm1762_vm2 = vmor %vm393_vm0, %vm394_vm1  ;;  %979 = vmatpush.bf16.msrb.mxu1 %v1366_v52  ;;  %992 = vmatpush.bf16.msrb.mxu2 %v1375_v57 }
  0xdb   :  { %v430_v6 = vsub.f32 1.0, %v429_v40  ;;  %v1752_v12 = vmul.f32 %v416_v51, %v1611_v43  ;;  %v437_v13 = vand.u32 2147483647, %v1686_v60  ;;  %v1755_v14 = vadd.f32 1.0, %v466_v44  ;;  %v1358_v51 = vld [vmem:[#allocation9 + $0x28] sm:$0xff]  ;;  %v1383_v44 = vld [vmem:[#allocation9 + $0xf0] sm:$0xff] }
  0xdc   :  { %v391_v41 = vmul.f32 %v1689_v62, %v390_v21  ;;  %v569_v15 = vmul.f32 %v568_v54, %v1702_v18  ;;  %v400_v21 = vor.u32 1.1754944e-38, %v399_v61  ;;  %v533_v43 = vmul.f32 %v532_v63, %v1672_v33  ;;  %965 = vmatpush.bf16.msrb.mxu0 %v1358_v51  ;;  %1006 = vmatpush.bf16.msrb.mxu3 %v1383_v44 }
  0xdd   :  { %v546_v22 = vmul.f32 %v545_v9, %v1672_v33  ;;  %v580_v23 = vmul.f32 %v579_v11, %v1702_v18  ;;  %v454_v47 = vadd.f32 0.18741608, %v453_v4  ;;  %v490_v30 = vadd.f32 0.0036580483, %v489_v7 }
  0xde   :  { %v392_v2 = vadd.f32 %v1689_v62, %v391_v41  ;;  %v605_v28 = vmul.f32 %v1748_v5, %v1748_v5  ;;  %v431_v31 = vmul.f32 %v1711_v32, %v430_v6  ;;  %v505_v36 = vadd.f32 0.4994258, %v504_v8  ;;  %v1357_v6 = vld [vmem:[#allocation9 + $0x20] sm:$0xff]  ;;  %993 = vmatpush.bf16.msrb.mxu2 %v1374_v19 }
  0xdf   :  { %v1775_v38 = vadd.f32 1.0, %v546_v22  ;;  %v581_v45 = vadd.f32 0.014752088, %v580_v23  ;;  %vm398_vm3 = vcmp.eq.f32.partialorder %v397_v35, 8.507059e+37  ;;  %1401 = vrcp.f32 %v1755_v14  ;;  %v1365_v8 = vld [vmem:[#allocation9 + $0x60] sm:$0xff] }
  0xe0   :  { %v396_v27 = vsel %vm1762_vm2, %v1689_v62, %v392_v2  ;;  %v570_v41 = vadd.f32 0.0036580483, %v569_v15  ;;  %v1778_v62 = vmin.f32 %v605_v28, 16.0  ;;  %v534_v40 = vadd.f32 0.18741608, %v533_v43  ;;  %966 = vmatpush.bf16.msrb.mxu0 %v1357_v6  ;;  %980 = vmatpush.bf16.msrb.mxu1 %v1365_v8 }
  0xe1   :  { %v401_v7 = vsel %vm398_vm3, %v400_v21, %v396_v27  ;;  %1403 = vrcp.f32 %v1775_v38  ;;  %v1782_v55 = vmul.f32 0.70710677, %v1729_v48  ;;  %v439_v54 = vand.u32 2147483648, %v1686_v60  ;;  %1007 = vmatpush.bf16.msrb.mxu3 %v1382_v20  ;;  %v1380_v20 = vld [vmem:[#allocation9 + $0xd8] sm:$0xff] }
  0xe2   :  { %v455_v35 = vmul.f32 %v454_v47, %v1642_v3  ;;  %v491_v59 = vmul.f32 %v490_v30, %v1665_v26  ;;  %v582_v37 = vmul.f32 %v581_v45, %v1702_v18  ;;  %v1789_v61 = vadd.f32 %v1711_v32, %v431_v31  ;;  %v1356_v47 = vld [vmem:[#allocation9 + $0x18] sm:$0xff] }
  0xe3   :  { %vm434_vm4 = vweird.f32 %v1711_v32  ;;  %v607_v63 = vmul.f32 2.1237322e-06, %v1778_v62  ;;  %v618_v42 = vmul.f32 3.8918573e-05, %v1778_v62  ;;  %v1795_v1 = vmul.f32 %v401_v7, %v1734_v53  ;;  %v1364_v30 = vld [vmem:[#allocation9 + $0x58] sm:$0xff] }
  0xe4   :  { %v506_v3 = vmul.f32 %v505_v36, %v1665_v26  ;;  %v571_v2 = vmul.f32 %v570_v41, %v1702_v18  ;;  %v583_v4 = vadd.f32 0.112945676, %v582_v37  ;;  %v535_v9 = vmul.f32 %v534_v40, %v1672_v33  ;;  %967 = vmatpush.bf16.msrb.mxu0 %v1356_v47  ;;  %981 = vmatpush.bf16.msrb.mxu1 %v1364_v30  ;;  %v1354_v47 = vld [vmem:[#allocation9 + $0x8] sm:$0xff] }
  0xe5   :  { %v608_v11 = vadd.f32 0.00028619796, %v607_v63  ;;  %v619_v15 = vadd.f32 0.001143296, %v618_v42  ;;  %v645_v17 = vmul.f32 %v1782_v55, %v1782_v55  ;;  %v1802_v21 = vpop.eup %1401  ;;  %vm433_vm5 = vweird.f32 %v1686_v60  ;;  %v1381_v60 = vld [vmem:[#allocation9 + $0xe0] sm:$0xff]  ;;  %v1355_v42 = vld [vmem:[#allocation9 + $0x10] sm:$0xff] }
  0xe6   :  { %v1805_v53 = vor.u32 1.1754944e-38, %v439_v54  ;;  %v1807_v43 = vadd.f32 0.05243302, %v491_v59  ;;  %v584_v22 = vmul.f32 %v583_v4, %v1702_v18  ;;  %v1812_v23 = vadd.f32 1.1283791, %v455_v35  ;;  %vm1823_vm6 = vmor %vm433_vm5, %vm434_vm4  ;;  %1008 = vmatpush.bf16.msrb.mxu3 %v1381_v60  ;;  %v1362_v30 = vld [vmem:[#allocation9 + $0x48] sm:$0xff] }
  0xe7   :  { %v1810_v33 = vpop.eup %1403  ;;  %v609_v24 = vmul.f32 %v608_v11, %v1778_v62  ;;  %v620_v25 = vmul.f32 %v619_v15, %v1778_v62  ;;  %v1816_v27 = vmin.f32 %v645_v17, 16.0  ;;  %v1185_v28 = vclamps-f32 %v1795_v1, 1.0  ;;  %v1363_v1 = vld [vmem:[#allocation9 + $0x50] sm:$0xff]  ;;  %v1372_v11 = vld [vmem:[#allocation9 + $0x98] sm:$0xff] }
  0xe8   :  { %v1827_v36 = vadd.f32 1.0, %v506_v3  ;;  %v549_v45 = vmul.f32 %v1810_v33, %v1775_v38  ;;  %v572_v41 = vadd.f32 0.05243302, %v571_v2  ;;  %v436_v51 = vsel %vm1823_vm6, %v1711_v32, %v1789_v61  ;;  %v1373_v32 = vld [vmem:[#allocation9 + $0xa0] sm:$0xff]  ;;  %968 = vmatpush.bf16.msrb.mxu0 %v1355_v42  ;;  %982 = vmatpush.bf16.msrb.mxu1 %v1363_v1 }
  0xe9   :  { %vm1837_vm7 = vcmp.eq.f32.partialorder %v437_v13, 8.507059e+37  ;;  %v536_v7 = vadd.f32 1.1283791, %v535_v9  ;;  %v585_v40 = vadd.f32 0.4994258, %v584_v22  ;;  %v1843_v44 = vmul.f32 %v1802_v21, %v1755_v14  ;;  %994 = vmatpush.bf16.msrb.mxu2 %v1373_v32 }
  0xea   :  { %v621_v57 = vadd.f32 0.014752088, %v620_v25  ;;  %v550_v54 = vsub.f32 1.0, %v549_v45  ;;  %v559_v35 = vand.u32 2147483648, %v1775_v38  ;;  %v647_v59 = vmul.f32 2.1237322e-06, %v1816_v27  ;;  %1009 = vmatpush.bf16.msrb.mxu3 %v1380_v20 }
  0xeb   :  { %v586_v13 = vmul.f32 %v585_v40, %v1702_v18  ;;  %v610_v37 = vadd.f32 0.0036580483, %v609_v24  ;;  %v658_v63 = vmul.f32 3.8918573e-05, %v1816_v27  ;;  %vm554_vm8 = vweird.f32 %v1810_v33 }
  0xec   :  { %v622_v61 = vmul.f32 %v621_v57, %v1778_v62  ;;  %v551_v3 = vmul.f32 %v1810_v33, %v550_v54  ;;  %v557_v2 = vand.u32 2147483647, %v1775_v38  ;;  %v573_v4 = vmul.f32 %v572_v41, %v1702_v18  ;;  %v1371_v57 = vld [vmem:[#allocation9 + $0x90] sm:$0xff]  ;;  %969 = vmatpush.bf16.msrb.mxu0 %v1354_v47  ;;  %983 = vmatpush.bf16.msrb.mxu1 %v1362_v30 }
  0xed   :  { %1405 = vrcp.f32 %v1827_v36  ;;  %v1855_v6 = vadd.f32 1.0, %v586_v13  ;;  %v648_v9 = vadd.f32 0.00028619796, %v647_v59  ;;  %v470_v15 = vsub.f32 1.0, %v1843_v44  ;;  %995 = vmatpush.bf16.msrb.mxu2 %v1372_v11  ;;  %v1379_v44 = vld [vmem:[#allocation9 + $0xd0] sm:$0xff] }
  0xee   :  { %v623_v8 = vadd.f32 0.112945676, %v622_v61  ;;  %v552_v17 = vadd.f32 %v1810_v33, %v551_v3  ;;  %vm553_vm9 = vweird.f32 %v1775_v38  ;;  %v659_v19 = vadd.f32 0.001143296, %v658_v63  ;;  %v1353_v61 = vld [vmem:[#allocation9] sm:$0xff]  ;;  %1010 = vmatpush.bf16.msrb.mxu3 %v1379_v44 }
  0xef   :  { %v537_v22 = vmul.f32 %v536_v7, %v1656_v16  ;;  %vm555_vm10 = vmor %vm553_vm9, %vm554_vm8  ;;  %v560_v24 = vor.u32 1.1754944e-38, %v559_v35  ;;  %1407 = vrcp.f32 %v1855_v6  ;;  %v611_v25 = vmul.f32 %v610_v37, %v1778_v62  ;;  %v1361_v63 = vld [vmem:[#allocation9 + $0x40] sm:$0xff] }
  0xf0   :  { %v556_v31 = vsel %vm555_vm10, %v1810_v33, %v552_v17  ;;  %vm558_vm11 = vcmp.eq.f32.partialorder %v557_v2, 8.507059e+37  ;;  %v574_v38 = vadd.f32 0.18741608, %v573_v4  ;;  %v624_v45 = vmul.f32 %v623_v8, %v1778_v62  ;;  %v1370_v4 = vld [vmem:[#allocation9 + $0x88] sm:$0xff]  ;;  %970 = vmatpush.bf16.msrb.mxu0 %v1353_v61  ;;  %984 = vmatpush.bf16.msrb.mxu1 %v1361_v63 }
  0xf1   :  { %v477_v16 = vand.u32 2147483647, %v1755_v14  ;;  %v561_v41 = vsel %vm558_vm11, %v560_v24, %v556_v31  ;;  %v649_v7 = vmul.f32 %v648_v9, %v1816_v27  ;;  %v660_v40 = vmul.f32 %v659_v19, %v1816_v27  ;;  %996 = vmatpush.bf16.msrb.mxu2 %v1371_v57  ;;  %v1378_v8 = vld [vmem:[#allocation9 + $0xc8] sm:$0xff]  ;;  %v1369_v31 = vld [vmem:[#allocation9 + $0x80] sm:$0xff] }
  0xf2   :  { %v685_v54 = vadd.f32 1.0, %v1185_v28  ;;  %v441_v33 = vsel %vm1837_vm7, %v1805_v53, %v436_v51  ;;  %v562_v35 = vmul.f32 %v561_v41, %v537_v22  ;;  %v625_v59 = vadd.f32 0.4994258, %v624_v45  ;;  %1011 = vmatpush.bf16.msrb.mxu3 %v1378_v8 }
  0xf3   :  { %v1873_v32 = vpop.eup %1405  ;;  %vm473_vm12 = vweird.f32 %v1755_v14  ;;  %v493_v60 = vmul.f32 %v1807_v43, %v1665_v26  ;;  %v612_v13 = vadd.f32 0.05243302, %v611_v25  ;;  %v661_v37 = vadd.f32 0.014752088, %v660_v40 }
  0xf4   :  { %v471_v28 = vmul.f32 %v1802_v21, %v470_v15  ;;  %v1189_v42 = vclamps-f32 %v562_v35, 1.0  ;;  %v575_v53 = vmul.f32 %v574_v38, %v1702_v18  ;;  %v626_v51 = vmul.f32 %v625_v59, %v1778_v62  ;;  %v1377_v38 = vld [vmem:[#allocation9 + $0xc0] sm:$0xff] }
  0xf5   :  { %v1408_v52 = vpop.eup %1407  ;;  %v442_v1 = vmul.f32 %v441_v33, %v1752_v12  ;;  %v479_v3 = vand.u32 2147483648, %v1755_v14  ;;  %v650_v2 = vadd.f32 0.0036580483, %v649_v7  ;;  %v662_v43 = vmul.f32 %v661_v37, %v1816_v27  ;;  %997 = vmatpush.bf16.msrb.mxu2 %v1370_v4 }
  0xf6   :  { %v693_v9 = vmul.f32 %v685_v54, %v1707_v29  ;;  %vm474_vm13 = vweird.f32 %v1802_v21  ;;  %v689_v11 = vadd.f32 1.0, %v1189_v42  ;;  %v589_v18 = vmul.f32 %v1408_v52, %v1855_v6  ;;  %1012 = vmatpush.bf16.msrb.mxu3 %v1377_v38 }
  0xf7   :  { %v509_v15 = vmul.f32 %v1873_v32, %v1827_v36  ;;  %v613_v12 = vmul.f32 %v612_v13, %v1778_v62  ;;  %v1890_v17 = vadd.f32 1.0, %v626_v51  ;;  %v663_v19 = vadd.f32 0.112945676, %v662_v43  ;;  %vm1903_vm15 = vmor %vm473_vm12, %vm474_vm13 }
  0xf8   :  { %v472_v20 = vadd.f32 %v1802_v21, %v471_v28  ;;  %v697_v22 = vmul.f32 %v689_v11, %v1717_v49  ;;  %v576_v29 = vadd.f32 1.1283791, %v575_v53  ;;  %v590_v24 = vsub.f32 1.0, %v589_v18 }
  0xf9   :  { %v597_v25 = vand.u32 2147483647, %v1855_v6  ;;  %v599_v47 = vand.u32 2147483648, %v1855_v6  ;;  %1409 = vrcp.f32 %v1890_v17  ;;  %v651_v30 = vmul.f32 %v650_v2, %v1816_v27  ;;  %998 = vmatpush.bf16.msrb.mxu2 %v1369_v31 }
  0xfa   :  { %v591_v45 = vmul.f32 %v1408_v52, %v590_v24  ;;  %vm594_vm14 = vweird.f32 %v1408_v52  ;;  %v664_v41 = vmul.f32 %v663_v19, %v1816_v27  ;;  %v703_v7 = vpack.c.bf16 %v697_v22, %v693_v9 }
  0xfb   :  { %vm1907_vm0 = vcmp.eq.f32.partialorder %v477_v16, 8.507059e+37  ;;  %v494_v57 = vadd.f32 0.18741608, %v493_v60  ;;  %v510_v44 = vsub.f32 1.0, %v509_v15  ;;  %v614_v54 = vadd.f32 0.18741608, %v613_v12 }
  0xfc   :  { %v476_v33 = vsel %vm1903_vm15, %v1802_v21, %v472_v20  ;;  %v592_v35 = vadd.f32 %v1408_v52, %v591_v45  ;;  %vm593_vm1 = vweird.f32 %v1855_v6  ;;  %v665_v59 = vadd.f32 0.4994258, %v664_v41  ;;  %971 = vmatmul.bf16.vlgmr.msrb.gmra.mxu0 %v703_v7 }
  0xfd   :  { %v1186_v14 = vclamps-f32 %v442_v1, 1.0  ;;  %v480_v13 = vor.u32 1.1754944e-38, %v479_v3  ;;  %vm595_vm2 = vmor %vm593_vm1, %vm594_vm14  ;;  %v600_v16 = vor.u32 1.1754944e-38, %v599_v47  ;;  %v652_v37 = vadd.f32 0.05243302, %v651_v30 }
  0xfe   :  { %v577_v60 = vmul.f32 %v576_v29, %v1683_v58  ;;  %v596_v61 = vsel %vm595_vm2, %v1408_v52, %v592_v35  ;;  %vm598_vm3 = vcmp.eq.f32.partialorder %v597_v25, 8.507059e+37  ;;  %v666_v63 = vmul.f32 %v665_v59, %v1816_v27 }
  0xff   :  { %v1410_v21 = vpop.eup %1409  ;;  %v481_v6 = vsel %vm1907_vm0, %v480_v13, %v476_v33  ;;  %v511_v28 = vmul.f32 %v1873_v32, %v510_v44  ;;  %v601_v42 = vsel %vm598_vm3, %v600_v16, %v596_v61  ;;  %v615_v53 = vmul.f32 %v614_v54, %v1778_v62 }
 0x100   :  { %v457_v51 = vmul.f32 %v1812_v23, %v1631_v56  ;;  %v495_v1 = vmul.f32 %v494_v57, %v1665_v26  ;;  %v602_v3 = vmul.f32 %v601_v42, %v577_v60  ;;  %v629_v58 = vmul.f32 %v1410_v21, %v1890_v17 }
 0x101   :  { %v686_v52 = vadd.f32 1.0, %v1186_v14  ;;  %v519_v2 = vand.u32 2147483648, %v1827_v36  ;;  %v653_v43 = vmul.f32 %v652_v37, %v1816_v27  ;;  %v667_v4 = vadd.f32 1.0, %v666_v63 }
 0x102   :  { %v482_v8 = vmul.f32 %v481_v6, %v457_v51  ;;  %vm514_vm4 = vweird.f32 %v1873_v32  ;;  %v1190_v9 = vclamps-f32 %v602_v3, 1.0  ;;  %v630_v11 = vsub.f32 1.0, %v629_v58 }
 0x103   :  { %v512_v62 = vadd.f32 %v1873_v32, %v511_v28  ;;  %v616_v18 = vadd.f32 1.1283791, %v615_v53  ;;  %v639_v56 = vand.u32 2147483648, %v1890_v17  ;;  %1411 = vrcp.f32 %v667_v4 }
 0x104   :  { %v690_v26 = vadd.f32 1.0, %v1190_v9  ;;  %v631_v23 = vmul.f32 %v1410_v21, %v630_v11  ;;  %vm634_vm5 = vweird.f32 %v1410_v21  ;;  %v637_v15 = vand.u32 2147483647, %v1890_v17 }
 0x105   :  { %v496_v12 = vadd.f32 1.1283791, %v495_v1  ;;  %vm513_vm6 = vweird.f32 %v1827_v36  ;;  %v517_v19 = vand.u32 2147483647, %v1827_v36  ;;  %v654_v20 = vadd.f32 0.18741608, %v653_v43 }
 0x106   :  { %v694_v22 = vmul.f32 %v686_v52, %v1714_v34  ;;  %vm1937_vm7 = vmor %vm513_vm6, %vm514_vm4  ;;  %v698_v24 = vmul.f32 %v690_v26, %v1721_v39  ;;  %v632_v25 = vadd.f32 %v1410_v21, %v631_v23  ;;  %vm633_vm8 = vweird.f32 %v1890_v17 }
 0x107   :  { %v1187_v47 = vclamps-f32 %v482_v8, 1.0  ;;  %v516_v30 = vsel %vm1937_vm7, %v1873_v32, %v512_v62  ;;  %v520_v36 = vor.u32 1.1754944e-38, %v519_v2  ;;  %vm635_vm9 = vmor %vm633_vm8, %vm634_vm5  ;;  %v640_v31 = vor.u32 1.1754944e-38, %v639_v56  ;;  %v1396_v62 = vld [vmem:[%s1967_s4] ss:$0 sm:$0xff] }
 0x108   :  { %v617_v34 = vmul.f32 %v616_v18, %v1748_v5  ;;  %v636_v38 = vsel %vm635_vm9, %v1410_v21, %v632_v25  ;;  %vm638_vm10 = vcmp.eq.f32.partialorder %v637_v15, 8.507059e+37  ;;  %v704_v45 = vpack.c.bf16 %v698_v24, %v694_v22 }
 0x109   :  { %v1412_v41 = vpop.eup %1411  ;;  %vm518_vm11 = vcmp.eq.f32.partialorder %v517_v19, 8.507059e+37  ;;  %v641_v7 = vsel %vm638_vm10, %v640_v31, %v636_v38  ;;  %v655_v39 = vmul.f32 %v654_v20, %v1816_v27  ;;  %v497_v57 = vmul.f32 %v496_v12, %v1650_v10 }
 0x10a   :  { %v521_v49 = vsel %vm518_vm11, %v520_v36, %v516_v30  ;;  %v642_v17 = vmul.f32 %v641_v7, %v617_v34  ;;  %v669_v40 = vmul.f32 %v1412_v41, %v667_v4  ;;  %985 = vmatmul.bf16.vlgmr.msrb.gmra.mxu1 %v704_v45  ;;  %v351_v32 = vmul.f32 0.5, %v1624_v50 }
 0x10b   :  { %v687_v44 = vadd.f32 1.0, %v1187_v47  ;;  %v522_v5 = vmul.f32 %v521_v49, %v497_v57  ;;  %v355_v35 = vmul.f32 0.5, %v1725_v46  ;;  %v656_v59 = vadd.f32 1.1283791, %v655_v39 }
 0x10c   :  { %v1191_v54 = vclamps-f32 %v642_v17, 1.0  ;;  %v670_v33 = vsub.f32 1.0, %v669_v40  ;;  %v679_v14 = vand.u32 2147483648, %v667_v4  ;;  %vm674_vm12 = vweird.f32 %v1412_v41 }
 0x10d   :  { %v677_v27 = vand.u32 2147483647, %v667_v4  ;;  %v695_v37 = vmul.f32 %v687_v44, %v351_v32  ;;  %vm673_vm13 = vweird.f32 %v667_v4  ;;  %v1188_v63 = vclamps-f32 %v522_v5, 1.0 }
 0x10e   :  { %v691_v13 = vadd.f32 1.0, %v1191_v54  ;;  %v671_v16 = vmul.f32 %v1412_v41, %v670_v33  ;;  %vm675_vm14 = vmor %vm673_vm13, %vm674_vm12  ;;  %v680_v10 = vor.u32 1.1754944e-38, %v679_v14  ;;  %v657_v50 = vmul.f32 %v656_v59, %v1782_v55 }
 0x10f   :  { %vm678_vm15 = vcmp.eq.f32.partialorder %v677_v27, 8.507059e+37  ;;  %v688_v42 = vadd.f32 1.0, %v1188_v63  ;;  %v352_v51 = vmul.f32 0.5, %v1640_v0  ;;  %v356_v1 = vmul.f32 0.5, %v1729_v48 }
 0x110   :  { %v699_v60 = vmul.f32 %v691_v13, %v355_v35  ;;  %v672_v61 = vadd.f32 %v1412_v41, %v671_v16 }
 0x111   :  { %v696_v58 = vmul.f32 %v688_v42, %v352_v51 }
 0x112   :  { %v676_v21 = vsel %vm675_vm14, %v1412_v41, %v672_v61  ;;  %v705_v6 = vpack.c.bf16 %v699_v60, %v695_v37 }
 0x113   :  { %v681_v28 = vsel %vm678_vm15, %v680_v10, %v676_v21 }
 0x114   :  { %v682_v46 = vmul.f32 %v681_v28, %v657_v50  ;;  %999 = vmatmul.bf16.vlgmr.msrb.gmra.mxu2 %v705_v6 }
 0x116   :  { %v1192_v53 = vclamps-f32 %v682_v46, 1.0 }
 0x118   :  { %v692_v3 = vadd.f32 1.0, %v1192_v53 }
 0x11a   :  { %v700_v52 = vmul.f32 %v692_v3, %v356_v1 }
 0x11c   :  { %v706_v2 = vpack.c.bf16 %v700_v52, %v696_v58 }
 0x11e   :  { %1013 = vmatmul.bf16.vlgmr.msrb.gmra.mxu3 %v706_v2 }
 0x179   :  { %v972_v43 = vpop.f32.mrf.mxu0 }
 0x181   :  { %v974_v11 = vpop.f32.mrf.mxu0 }
 0x187   :  { %v986_v4 = vpop.f32.mrf.mxu1 }
 0x188   :  { %v987_v8 = vadd.f32 %v986_v4, %v972_v43 }
 0x18f   :  { %v988_v18 = vpop.f32.mrf.mxu1 }
 0x190   :  { %v989_v48 = vadd.f32 %v988_v18, %v974_v11 }
 0x197   :  { %v1000_v55 = vpop.f32.mrf.mxu2 }
 0x198   :  { %v1001_v9 = vadd.f32 %v1000_v55, %v987_v8 }
 0x19f   :  { %v1002_v26 = vpop.f32.mrf.mxu2 }
 0x1a0   :  { %v1003_v15 = vadd.f32 %v1002_v26, %v989_v48 }
 0x1a1   :  { %v1014_v56 = vpop.f32.mrf.mxu3 }
 0x1a2   :  { %v1015_v0 = vadd.f32 %v1014_v56, %v1001_v9 }
 0x1a4   :  { %v1032_v23 = vadd.f32 %v1396_v62, %v1015_v0 }
 0x1a6   :  { %1034 = vst [vmem:[#allocation11] sm:$0xff] %v1032_v23 }
 0x1a9   :  { %v1016_v12 = vpop.f32.mrf.mxu3 }
 0x1aa   :  { %v1017_v19 = vadd.f32 %v1016_v12, %v1003_v15 }
 0x1ac   :  { %v1033_v20 = vadd.f32 %v1396_v62, %v1017_v19 }
 0x1ae   :  { %1035 = vst [vmem:[#allocation11 + $0x8] sm:$0xff] %v1033_v20 }
 0x1af   :  { %1048 = dma.vmem_to_hbm [thread:$0]  %s1041_s18, 256, %s1043_s21, [#allocation5], %s1545_s30, %s1545_s30, %s1546_s6  }
 0x1b0   :  { %1539 = dma.done.wait [#allocation5], 256  }
 0x1b1   :  { %1540 = vsyncadd [#allocation5], 4294967040 }
 0x1b2   :  { %1053 = vsyncpa [#allocation4], 1 }
 0x1b3   :  { %1054 = vsyncpa [#allocation7], 1 }
 0x1b4   :  { %1055 = vsyncpa [#allocation10], 1 }
 0x1b5   :  { %1056 = vsyncpa [#allocation5], 1 }

</bundles_post_ra>
